<compile_context>
chip_gen: v7x
topology: tpu7x:2x2x1
jax: 0.10.0
libtpu: 0.0.40
codegen_flags: <defaults>
</compile_context>

<pallas_src>
import functools

import jax
import jax.numpy as jnp
from jax.experimental import pallas as pl
from jax.experimental.pallas import tpu as pltpu


def _round_up(x, m):
    return ((x + m - 1) // m) * m


def _conv_out_hw(s, k, st):
    return (s - k) // st + 1


# ---------------------------------------------------------------------------
# Kernels
# ---------------------------------------------------------------------------

def _matmul_bias_act_kernel(a_ref, w_ref, b_ref, o_ref, *, apply_relu):
    """o = relu?(a @ w + b) for one M-tile; bf16 MXU matmul, f32 accumulation."""
    acc = jnp.dot(a_ref[...], w_ref[...], preferred_element_type=jnp.float32)
    acc = acc + b_ref[...]
    if apply_relu:
        acc = jnp.maximum(acc, 0.0)
    o_ref[...] = acc.astype(o_ref.dtype)


def _fc_fused_kernel(x_ref, w1_ref, b1_ref, w2_ref, b2_ref, o_ref):
    """o = relu(x @ w1 + b1) @ w2 + b2 for one M-tile (both fc layers fused)."""
    h = jnp.dot(x_ref[...], w1_ref[...], preferred_element_type=jnp.float32)
    h = jnp.maximum(h + b1_ref[...], 0.0)
    out = jnp.dot(h.astype(w2_ref.dtype), w2_ref[...],
                  preferred_element_type=jnp.float32)
    o_ref[...] = (out + b2_ref[...]).astype(o_ref.dtype)


# ---------------------------------------------------------------------------
# Pallas wrappers
# ---------------------------------------------------------------------------

def pallas_matmul_bias(a, w, b, *, relu, out_dtype, tm=256):
    """relu?(a @ w + b), tiled over M.  a:(M,K), w:(K,N) bf16, b:(1,N) f32."""
    M, K = a.shape
    K2, N = w.shape
    assert K == K2, (K, K2)
    a = a.astype(jnp.bfloat16)
    tm_eff = min(tm, _round_up(M, 8))          # at least one full sublane tile of rows
    Mp = _round_up(M, tm_eff)
    if Mp != M:
        a = jnp.pad(a, ((0, Mp - M), (0, 0)))
    grid_m = Mp // tm_eff
    out = pl.pallas_call(
        functools.partial(_matmul_bias_act_kernel, apply_relu=relu),
        out_shape=jax.ShapeDtypeStruct((Mp, N), out_dtype),
        grid=(grid_m,),
        in_specs=[
            pl.BlockSpec((tm_eff, K), lambda i: (i, 0)),   # A: tiled over M, pipelined
            pl.BlockSpec((K, N), lambda i: (0, 0)),        # W: resident full block
            pl.BlockSpec((1, N), lambda i: (0, 0)),        # bias: resident
        ],
        out_specs=pl.BlockSpec((tm_eff, N), lambda i: (i, 0)),
        compiler_params=pltpu.CompilerParams(
            dimension_semantics=("parallel",)),
    )(a, w, b)
    return out[:M]


def pallas_fc_fused(x, w1, b1, w2, b2, *, tm=256):
    """relu(x @ w1 + b1) @ w2 + b2 in one kernel; weights stay VMEM-resident."""
    M, K = x.shape
    K1, N1 = w1.shape
    N1b, N2 = w2.shape
    assert K == K1 and N1 == N1b, (K, K1, N1, N1b)
    x = x.astype(jnp.bfloat16)
    tm_eff = min(tm, _round_up(M, 8))
    Mp = _round_up(M, tm_eff)
    if Mp != M:
        x = jnp.pad(x, ((0, Mp - M), (0, 0)))
    grid_m = Mp // tm_eff
    out = pl.pallas_call(
        _fc_fused_kernel,
        out_shape=jax.ShapeDtypeStruct((Mp, N2), jnp.float32),
        grid=(grid_m,),
        in_specs=[
            pl.BlockSpec((tm_eff, K), lambda i: (i, 0)),
            pl.BlockSpec((K, N1), lambda i: (0, 0)),
            pl.BlockSpec((1, N1), lambda i: (0, 0)),
            pl.BlockSpec((N1, N2), lambda i: (0, 0)),
            pl.BlockSpec((1, N2), lambda i: (0, 0)),
        ],
        out_specs=pl.BlockSpec((tm_eff, N2), lambda i: (i, 0)),
        compiler_params=pltpu.CompilerParams(
            dimension_semantics=("parallel",)),
    )(x, w1, b1, w2, b2)
    return out[:M]


# ---------------------------------------------------------------------------
# Conv via NHWC im2col + GEMM
# ---------------------------------------------------------------------------

def im2col_nhwc(x, kh, kw, stride):
    """x: (B,H,W,C) -> (B*Ho*Wo, kh*kw*C); channels stay on the lane axis."""
    B, H, W, C = x.shape
    Ho = _conv_out_hw(H, kh, stride)
    Wo = _conv_out_hw(W, kw, stride)
    patches = [
        x[:, di:di + stride * Ho:stride, dj:dj + stride * Wo:stride, :]
        for di in range(kh)
        for dj in range(kw)
    ]                                    # kh*kw slices, each (B, Ho, Wo, C)
    cols = jnp.stack(patches, axis=3)    # (B, Ho, Wo, kh*kw, C)
    return cols.reshape(B * Ho * Wo, kh * kw * C), Ho, Wo


def conv2d_pallas(x_nhwc, w2d, bias, *, kh, kw, stride):
    """Conv2d (valid padding) + ReLU via NHWC im2col + M-tiled GEMM.  Output NHWC bf16."""
    B = x_nhwc.shape[0]
    cols, Ho, Wo = im2col_nhwc(x_nhwc, kh, kw, stride)
    C_out = w2d.shape[1]
    out = pallas_matmul_bias(cols, w2d, bias, relu=True, out_dtype=jnp.bfloat16)
    return out.reshape(B, Ho, Wo, C_out)


# ---------------------------------------------------------------------------
# Parameters
# ---------------------------------------------------------------------------

def init_params(key, input_shape, n_actions):
    """Deterministic synthetic parameters in PyTorch layout (AtariPGN.__init__ shapes)."""
    C, H, W = input_shape
    ks = jax.random.split(key, 10)

    def wn(k, shape, fan_in):
        return jax.random.normal(k, shape, jnp.float32) * (1.0 / jnp.sqrt(fan_in))

    params = {
        "c1_w": wn(ks[0], (32, C, 8, 8), C * 8 * 8),
        "c1_b": wn(ks[1], (32,), C * 8 * 8),
        "c2_w": wn(ks[2], (64, 32, 4, 4), 32 * 4 * 4),
        "c2_b": wn(ks[3], (64,), 32 * 4 * 4),
        "c3_w": wn(ks[4], (64, 64, 3, 3), 64 * 3 * 3),
        "c3_b": wn(ks[5], (64,), 64 * 3 * 3),
    }
    h = _conv_out_hw(_conv_out_hw(_conv_out_hw(H, 8, 4), 4, 2), 3, 1)
    w = _conv_out_hw(_conv_out_hw(_conv_out_hw(W, 8, 4), 4, 2), 3, 1)
    conv_out_size = 64 * h * w
    params["f1_w"] = wn(ks[6], (conv_out_size, 512), conv_out_size)
    params["f1_b"] = wn(ks[7], (512,), conv_out_size)
    params["f2_w"] = wn(ks[8], (512, n_actions), 512)
    params["f2_b"] = wn(ks[9], (n_actions,), 512)
    return params


def prepare_params(params, input_shape, n_actions):
    """One-time layout/dtype prep (outside the hot path):
      - conv weights -> (kh*kw*Cin, Cout) bf16, matching the NHWC im2col flatten,
        with the x/256 input scale folded into conv1;
      - fc1 rows permuted from the torch NCHW flatten to the NHWC flatten;
      - fc2 output dim zero-padded to a lane-dense 128;
      - biases as (1, N) f32 rows."""
    C, H, W = input_shape

    def conv_w(w, scale=1.0):
        C_out, C_in, kh, kw = w.shape
        w2d = (w * scale).transpose(2, 3, 1, 0).reshape(kh * kw * C_in, C_out)
        return w2d.astype(jnp.bfloat16)

    def bias2d(b):
        return b.reshape(1, -1).astype(jnp.float32)

    h1, w1 = _conv_out_hw(H, 8, 4), _conv_out_hw(W, 8, 4)
    h2, w2 = _conv_out_hw(h1, 4, 2), _conv_out_hw(w1, 4, 2)
    h3, w3 = _conv_out_hw(h2, 3, 1), _conv_out_hw(w2, 3, 1)

    # fc1 rows are laid out for a torch NCHW (c, h, w) flatten; reorder to NHWC (h, w, c).
    f1 = params["f1_w"].reshape(64, h3, w3, 512).transpose(1, 2, 0, 3)
    f1 = f1.reshape(h3 * w3 * 64, 512).astype(jnp.bfloat16)

    n_pad = _round_up(max(n_actions, 1), 128)
    f2 = jnp.pad(params["f2_w"], ((0, 0), (0, n_pad - n_actions))).astype(jnp.bfloat16)
    f2_b = jnp.pad(params["f2_b"], (0, n_pad - n_actions)).reshape(1, n_pad)

    return {
        "c1_w": conv_w(params["c1_w"], scale=1.0 / 256.0),   # fold x/256 into conv1
        "c1_b": bias2d(params["c1_b"]),
        "c2_w": conv_w(params["c2_w"]),
        "c2_b": bias2d(params["c2_b"]),
        "c3_w": conv_w(params["c3_w"]),
        "c3_b": bias2d(params["c3_b"]),
        "f1_w": f1,
        "f1_b": bias2d(params["f1_b"]),
        "f2_w": f2,
        "f2_b": f2_b.astype(jnp.float32),
    }


# ---------------------------------------------------------------------------
# Forward
# ---------------------------------------------------------------------------

@functools.partial(jax.jit, static_argnames=("n_actions",))
def atari_pgn_forward(kparams, x, *, n_actions):
    """x: (B, C, H, W) uint8 frames; returns (B, n_actions) f32.

    Matches AtariPGN.forward: conv(8/4)-ReLU, conv(4/2)-ReLU, conv(3/1)-ReLU,
    flatten, fc(512)-ReLU, fc(n_actions).  The x/256 scale lives in conv1's weights
    and the flatten permutation lives in fc1's weights, so no extra XLA passes.
    """
    B = x.shape[0]
    xh = jnp.transpose(x, (0, 2, 3, 1)).astype(jnp.bfloat16)   # NCHW -> NHWC (exact for u8)
    h = conv2d_pallas(xh, kparams["c1_w"], kparams["c1_b"], kh=8, kw=8, stride=4)
    h = conv2d_pallas(h, kparams["c2_w"], kparams["c2_b"], kh=4, kw=4, stride=2)
    h = conv2d_pallas(h, kparams["c3_w"], kparams["c3_b"], kh=3, kw=3, stride=1)
    flat = h.reshape(B, -1)                                    # NHWC flatten; fc1 pre-permuted
    out = pallas_fc_fused(flat, kparams["f1_w"], kparams["f1_b"],
                          kparams["f2_w"], kparams["f2_b"])
    return out[:, :n_actions]


if __name__ == "__main__":
    key = jax.random.PRNGKey(0)
    k_x, k_p = jax.random.split(key)

    # Small Atari-like input: 4 stacked frames of 36x36 (conv stack stays valid:
    # 36 -> 8 -> 3 -> 1 spatial, conv_out_size = 64).
    input_shape = (4, 36, 36)
    n_actions = 6
    batch = 2

    x = jax.random.randint(
        k_x, (batch,) + input_shape, 0, 256, dtype=jnp.int32
    ).astype(jnp.uint8)

    torch_layout_params = init_params(k_p, input_shape, n_actions)
    kparams = prepare_params(torch_layout_params, input_shape, n_actions)

    out = atari_pgn_forward(kparams, x, n_actions=n_actions)
    out = jax.block_until_ready(out)
    assert out.shape == (batch, n_actions), out.shape
    assert out.dtype == jnp.float32
    print("KERNEL_OK")
</pallas_src>

<mosaic_0001>
module attributes {stable_mosaic.version = 11 : i64} {
  func.func @_matmul_bias_act_kernel(%arg0: i32, %arg1: memref<128x256xbf16, #tpu.memory_space<vmem>>, %arg2: memref<256x32xbf16, #tpu.memory_space<vmem>>, %arg3: memref<1x32xf32, #tpu.memory_space<vmem>>, %arg4: memref<128x32xbf16, #tpu.memory_space<vmem>>) attributes {dimension_semantics = [#tpu.dimension_semantics<parallel>], iteration_bounds = array<i64: 1>, scalar_prefetch = 0 : i64, scratch_operands = 0 : i64, tpu.core_type = #tpu.core_type<tc>, window_params = [{transform_indices = @transform_0, window_bounds = array<i64: 128, 256>}, {pipeline_mode = #tpu.pipeline_mode<synchronous>, transform_indices = @transform_1, window_bounds = array<i64: 256, 32>}, {pipeline_mode = #tpu.pipeline_mode<synchronous>, transform_indices = @transform_2, window_bounds = array<i64: 1, 32>}, {transform_indices = @transform_3, window_bounds = array<i64: 128, 32>}]} {
    %c0 = arith.constant 0 : index
    %c0_0 = arith.constant 0 : index
    %0 = vector.load %arg1[%c0, %c0_0] : memref<128x256xbf16, #tpu.memory_space<vmem>>, vector<128x256xbf16>
    %c0_1 = arith.constant 0 : index
    %c0_2 = arith.constant 0 : index
    %1 = vector.load %arg2[%c0_1, %c0_2] : memref<256x32xbf16, #tpu.memory_space<vmem>>, vector<256x32xbf16>
    %cst = arith.constant dense<0.000000e+00> : vector<128x32xf32>
    %2 = tpu.matmul %0, %1, %cst {dimension_numbers = #tpu.dot_dimension_numbers<[1], [0], [0], [1], [0, 0, 1, 1], [], []>} : vector<128x256xbf16>, vector<256x32xbf16>, vector<128x32xf32> -> vector<128x32xf32>
    %c0_3 = arith.constant 0 : index
    %c0_4 = arith.constant 0 : index
    %3 = vector.load %arg3[%c0_3, %c0_4] : memref<1x32xf32, #tpu.memory_space<vmem>>, vector<1x32xf32>
    %4 = vector.broadcast %3 : vector<1x32xf32> to vector<128x32xf32>
    %5 = arith.addf %2, %4 : vector<128x32xf32>
    %cst_5 = arith.constant 0.000000e+00 : f32
    %6 = vector.broadcast %cst_5 : f32 to vector<128x32xf32>
    %7 = arith.maximumf %5, %6 : vector<128x32xf32>
    %8 = arith.truncf %7 : vector<128x32xf32> to vector<128x32xbf16>
    %c0_6 = arith.constant 0 : index
    %c0_7 = arith.constant 0 : index
    %9 = vector.load %arg4[%c0_6, %c0_7] : memref<128x32xbf16, #tpu.memory_space<vmem>>, vector<128x32xbf16>
    tpu.vector_store %arg4[%c0_6, %c0_7], %8 {strides = array<i32>} : memref<128x32xbf16, #tpu.memory_space<vmem>>, vector<128x32xbf16>,
    return
  }
  func.func @transform_0(%arg0: i32) -> (i32, i32) {
    %c0_i32 = arith.constant 0 : i32
    %c0_i32_0 = arith.constant 0 : i32
    return %arg0, %c0_i32 : i32, i32
  }
  func.func @transform_1(%arg0: i32) -> (i32, i32) {
    %c0_i32 = arith.constant 0 : i32
    %c0_i32_0 = arith.constant 0 : i32
    %c0_i32_1 = arith.constant 0 : i32
    return %c0_i32, %c0_i32_0 : i32, i32
  }
  func.func @transform_2(%arg0: i32) -> (i32, i32) {
    %c0_i32 = arith.constant 0 : i32
    %c0_i32_0 = arith.constant 0 : i32
    %c0_i32_1 = arith.constant 0 : i32
    return %c0_i32, %c0_i32_0 : i32, i32
  }
  func.func @transform_3(%arg0: i32) -> (i32, i32) {
    %c0_i32 = arith.constant 0 : i32
    %c0_i32_0 = arith.constant 0 : i32
    return %arg0, %c0_i32 : i32, i32
  }
}

module attributes {stable_mosaic.version = 11 : i64} {
  func.func @_matmul_bias_act_kernel(%arg0: i32, %arg1: memref<24x512xbf16, #tpu.memory_space<vmem>>, %arg2: memref<512x64xbf16, #tpu.memory_space<vmem>>, %arg3: memref<1x64xf32, #tpu.memory_space<vmem>>, %arg4: memref<24x64xbf16, #tpu.memory_space<vmem>>) attributes {dimension_semantics = [#tpu.dimension_semantics<parallel>], iteration_bounds = array<i64: 1>, scalar_prefetch = 0 : i64, scratch_operands = 0 : i64, tpu.core_type = #tpu.core_type<tc>, window_params = [{transform_indices = @transform_0, window_bounds = array<i64: 24, 512>}, {pipeline_mode = #tpu.pipeline_mode<synchronous>, transform_indices = @transform_1, window_bounds = array<i64: 512, 64>}, {pipeline_mode = #tpu.pipeline_mode<synchronous>, transform_indices = @transform_2, window_bounds = array<i64: 1, 64>}, {transform_indices = @transform_3, window_bounds = array<i64: 24, 64>}]} {
    %c0 = arith.constant 0 : index
    %c0_0 = arith.constant 0 : index
    %0 = vector.load %arg1[%c0, %c0_0] : memref<24x512xbf16, #tpu.memory_space<vmem>>, vector<24x512xbf16>
    %c0_1 = arith.constant 0 : index
    %c0_2 = arith.constant 0 : index
    %1 = vector.load %arg2[%c0_1, %c0_2] : memref<512x64xbf16, #tpu.memory_space<vmem>>, vector<512x64xbf16>
    %cst = arith.constant dense<0.000000e+00> : vector<24x64xf32>
    %2 = tpu.matmul %0, %1, %cst {dimension_numbers = #tpu.dot_dimension_numbers<[1], [0], [0], [1], [0, 0, 1, 1], [], []>} : vector<24x512xbf16>, vector<512x64xbf16>, vector<24x64xf32> -> vector<24x64xf32>
    %c0_3 = arith.constant 0 : index
    %c0_4 = arith.constant 0 : index
    %3 = vector.load %arg3[%c0_3, %c0_4] : memref<1x64xf32, #tpu.memory_space<vmem>>, vector<1x64xf32>
    %4 = vector.broadcast %3 : vector<1x64xf32> to vector<24x64xf32>
    %5 = arith.addf %2, %4 : vector<24x64xf32>
    %cst_5 = arith.constant 0.000000e+00 : f32
    %6 = vector.broadcast %cst_5 : f32 to vector<24x64xf32>
    %7 = arith.maximumf %5, %6 : vector<24x64xf32>
    %8 = arith.truncf %7 : vector<24x64xf32> to vector<24x64xbf16>
    %c0_6 = arith.constant 0 : index
    %c0_7 = arith.constant 0 : index
    %9 = vector.load %arg4[%c0_6, %c0_7] : memref<24x64xbf16, #tpu.memory_space<vmem>>, vector<24x64xbf16>
    tpu.vector_store %arg4[%c0_6, %c0_7], %8 {strides = array<i32>} : memref<24x64xbf16, #tpu.memory_space<vmem>>, vector<24x64xbf16>,
    return
  }
  func.func @transform_0(%arg0: i32) -> (i32, i32) {
    %c0_i32 = arith.constant 0 : i32
    %c0_i32_0 = arith.constant 0 : i32
    return %arg0, %c0_i32 : i32, i32
  }
  func.func @transform_1(%arg0: i32) -> (i32, i32) {
    %c0_i32 = arith.constant 0 : i32
    %c0_i32_0 = arith.constant 0 : i32
    %c0_i32_1 = arith.constant 0 : i32
    return %c0_i32, %c0_i32_0 : i32, i32
  }
  func.func @transform_2(%arg0: i32) -> (i32, i32) {
    %c0_i32 = arith.constant 0 : i32
    %c0_i32_0 = arith.constant 0 : i32
    %c0_i32_1 = arith.constant 0 : i32
    return %c0_i32, %c0_i32_0 : i32, i32
  }
  func.func @transform_3(%arg0: i32) -> (i32, i32) {
    %c0_i32 = arith.constant 0 : i32
    %c0_i32_0 = arith.constant 0 : i32
    return %arg0, %c0_i32 : i32, i32
  }
}

module attributes {stable_mosaic.version = 11 : i64} {
  func.func @_matmul_bias_act_kernel(%arg0: i32, %arg1: memref<8x576xbf16, #tpu.memory_space<vmem>>, %arg2: memref<576x64xbf16, #tpu.memory_space<vmem>>, %arg3: memref<1x64xf32, #tpu.memory_space<vmem>>, %arg4: memref<8x64xbf16, #tpu.memory_space<vmem>>) attributes {dimension_semantics = [#tpu.dimension_semantics<parallel>], iteration_bounds = array<i64: 1>, scalar_prefetch = 0 : i64, scratch_operands = 0 : i64, tpu.core_type = #tpu.core_type<tc>, window_params = [{transform_indices = @transform_0, window_bounds = array<i64: 8, 576>}, {pipeline_mode = #tpu.pipeline_mode<synchronous>, transform_indices = @transform_1, window_bounds = array<i64: 576, 64>}, {pipeline_mode = #tpu.pipeline_mode<synchronous>, transform_indices = @transform_2, window_bounds = array<i64: 1, 64>}, {transform_indices = @transform_3, window_bounds = array<i64: 8, 64>}]} {
    %c0 = arith.constant 0 : index
    %c0_0 = arith.constant 0 : index
    %0 = vector.load %arg1[%c0, %c0_0] : memref<8x576xbf16, #tpu.memory_space<vmem>>, vector<8x576xbf16>
    %c0_1 = arith.constant 0 : index
    %c0_2 = arith.constant 0 : index
    %1 = vector.load %arg2[%c0_1, %c0_2] : memref<576x64xbf16, #tpu.memory_space<vmem>>, vector<576x64xbf16>
    %cst = arith.constant dense<0.000000e+00> : vector<8x64xf32>
    %2 = tpu.matmul %0, %1, %cst {dimension_numbers = #tpu.dot_dimension_numbers<[1], [0], [0], [1], [0, 0, 1, 1], [], []>} : vector<8x576xbf16>, vector<576x64xbf16>, vector<8x64xf32> -> vector<8x64xf32>
    %c0_3 = arith.constant 0 : index
    %c0_4 = arith.constant 0 : index
    %3 = vector.load %arg3[%c0_3, %c0_4] : memref<1x64xf32, #tpu.memory_space<vmem>>, vector<1x64xf32>
    %4 = vector.broadcast %3 : vector<1x64xf32> to vector<8x64xf32>
    %5 = arith.addf %2, %4 : vector<8x64xf32>
    %cst_5 = arith.constant 0.000000e+00 : f32
    %6 = vector.broadcast %cst_5 : f32 to vector<8x64xf32>
    %7 = arith.maximumf %5, %6 : vector<8x64xf32>
    %8 = arith.truncf %7 : vector<8x64xf32> to vector<8x64xbf16>
    %c0_6 = arith.constant 0 : index
    %c0_7 = arith.constant 0 : index
    %9 = vector.load %arg4[%c0_6, %c0_7] : memref<8x64xbf16, #tpu.memory_space<vmem>>, vector<8x64xbf16>
    tpu.vector_store %arg4[%c0_6, %c0_7], %8 {strides = array<i32>} : memref<8x64xbf16, #tpu.memory_space<vmem>>, vector<8x64xbf16>,
    return
  }
  func.func @transform_0(%arg0: i32) -> (i32, i32) {
    %c0_i32 = arith.constant 0 : i32
    %c0_i32_0 = arith.constant 0 : i32
    return %arg0, %c0_i32 : i32, i32
  }
  func.func @transform_1(%arg0: i32) -> (i32, i32) {
    %c0_i32 = arith.constant 0 : i32
    %c0_i32_0 = arith.constant 0 : i32
    %c0_i32_1 = arith.constant 0 : i32
    return %c0_i32, %c0_i32_0 : i32, i32
  }
  func.func @transform_2(%arg0: i32) -> (i32, i32) {
    %c0_i32 = arith.constant 0 : i32
    %c0_i32_0 = arith.constant 0 : i32
    %c0_i32_1 = arith.constant 0 : i32
    return %c0_i32, %c0_i32_0 : i32, i32
  }
  func.func @transform_3(%arg0: i32) -> (i32, i32) {
    %c0_i32 = arith.constant 0 : i32
    %c0_i32_0 = arith.constant 0 : i32
    return %arg0, %c0_i32 : i32, i32
  }
}

module attributes {stable_mosaic.version = 11 : i64} {
  func.func @_fc_fused_kernel(%arg0: i32, %arg1: memref<8x64xbf16, #tpu.memory_space<vmem>>, %arg2: memref<64x512xbf16, #tpu.memory_space<vmem>>, %arg3: memref<1x512xf32, #tpu.memory_space<vmem>>, %arg4: memref<512x128xbf16, #tpu.memory_space<vmem>>, %arg5: memref<1x128xf32, #tpu.memory_space<vmem>>, %arg6: memref<8x128xf32, #tpu.memory_space<vmem>>) attributes {dimension_semantics = [#tpu.dimension_semantics<parallel>], iteration_bounds = array<i64: 1>, scalar_prefetch = 0 : i64, scratch_operands = 0 : i64, tpu.core_type = #tpu.core_type<tc>, window_params = [{transform_indices = @transform_0, window_bounds = array<i64: 8, 64>}, {pipeline_mode = #tpu.pipeline_mode<synchronous>, transform_indices = @transform_1, window_bounds = array<i64: 64, 512>}, {pipeline_mode = #tpu.pipeline_mode<synchronous>, transform_indices = @transform_2, window_bounds = array<i64: 1, 512>}, {pipeline_mode = #tpu.pipeline_mode<synchronous>, transform_indices = @transform_3, window_bounds = array<i64: 512, 128>}, {pipeline_mode = #tpu.pipeline_mode<synchronous>, transform_indices = @transform_4, window_bounds = array<i64: 1, 128>}, {transform_indices = @transform_5, window_bounds = array<i64: 8, 128>}]} {
    %c0 = arith.constant 0 : index
    %c0_0 = arith.constant 0 : index
    %0 = vector.load %arg1[%c0, %c0_0] : memref<8x64xbf16, #tpu.memory_space<vmem>>, vector<8x64xbf16>
    %c0_1 = arith.constant 0 : index
    %c0_2 = arith.constant 0 : index
    %1 = vector.load %arg2[%c0_1, %c0_2] : memref<64x512xbf16, #tpu.memory_space<vmem>>, vector<64x512xbf16>
    %cst = arith.constant dense<0.000000e+00> : vector<8x512xf32>
    %2 = tpu.matmul %0, %1, %cst {dimension_numbers = #tpu.dot_dimension_numbers<[1], [0], [0], [1], [0, 0, 1, 1], [], []>} : vector<8x64xbf16>, vector<64x512xbf16>, vector<8x512xf32> -> vector<8x512xf32>
    %c0_3 = arith.constant 0 : index
    %c0_4 = arith.constant 0 : index
    %3 = vector.load %arg3[%c0_3, %c0_4] : memref<1x512xf32, #tpu.memory_space<vmem>>, vector<1x512xf32>
    %4 = vector.broadcast %3 : vector<1x512xf32> to vector<8x512xf32>
    %5 = arith.addf %2, %4 : vector<8x512xf32>
    %cst_5 = arith.constant 0.000000e+00 : f32
    %6 = vector.broadcast %cst_5 : f32 to vector<8x512xf32>
    %7 = arith.maximumf %5, %6 : vector<8x512xf32>
    %8 = arith.truncf %7 : vector<8x512xf32> to vector<8x512xbf16>
    %c0_6 = arith.constant 0 : index
    %c0_7 = arith.constant 0 : index
    %9 = vector.load %arg4[%c0_6, %c0_7] : memref<512x128xbf16, #tpu.memory_space<vmem>>, vector<512x128xbf16>
    %cst_8 = arith.constant dense<0.000000e+00> : vector<8x128xf32>
    %10 = tpu.matmul %8, %9, %cst_8 {dimension_numbers = #tpu.dot_dimension_numbers<[1], [0], [0], [1], [0, 0, 1, 1], [], []>} : vector<8x512xbf16>, vector<512x128xbf16>, vector<8x128xf32> -> vector<8x128xf32>
    %c0_9 = arith.constant 0 : index
    %c0_10 = arith.constant 0 : index
    %11 = vector.load %arg5[%c0_9, %c0_10] : memref<1x128xf32, #tpu.memory_space<vmem>>, vector<1x128xf32>
    %12 = vector.broadcast %11 : vector<1x128xf32> to vector<8x128xf32>
    %13 = arith.addf %10, %12 : vector<8x128xf32>
    %c0_11 = arith.constant 0 : index
    %c0_12 = arith.constant 0 : index
    %14 = vector.load %arg6[%c0_11, %c0_12] : memref<8x128xf32, #tpu.memory_space<vmem>>, vector<8x128xf32>
    tpu.vector_store %arg6[%c0_11, %c0_12], %13 {strides = array<i32>} : memref<8x128xf32, #tpu.memory_space<vmem>>, vector<8x128xf32>,
    return
  }
  func.func @transform_0(%arg0: i32) -> (i32, i32) {
    %c0_i32 = arith.constant 0 : i32
    %c0_i32_0 = arith.constant 0 : i32
    return %arg0, %c0_i32 : i32, i32
  }
  func.func @transform_1(%arg0: i32) -> (i32, i32) {
    %c0_i32 = arith.constant 0 : i32
    %c0_i32_0 = arith.constant 0 : i32
    %c0_i32_1 = arith.constant 0 : i32
    return %c0_i32, %c0_i32_0 : i32, i32
  }
  func.func @transform_2(%arg0: i32) -> (i32, i32) {
    %c0_i32 = arith.constant 0 : i32
    %c0_i32_0 = arith.constant 0 : i32
    %c0_i32_1 = arith.constant 0 : i32
    return %c0_i32, %c0_i32_0 : i32, i32
  }
  func.func @transform_3(%arg0: i32) -> (i32, i32) {
    %c0_i32 = arith.constant 0 : i32
    %c0_i32_0 = arith.constant 0 : i32
    %c0_i32_1 = arith.constant 0 : i32
    return %c0_i32, %c0_i32_0 : i32, i32
  }
  func.func @transform_4(%arg0: i32) -> (i32, i32) {
    %c0_i32 = arith.constant 0 : i32
    %c0_i32_0 = arith.constant 0 : i32
    %c0_i32_1 = arith.constant 0 : i32
    return %c0_i32, %c0_i32_0 : i32, i32
  }
  func.func @transform_5(%arg0: i32) -> (i32, i32) {
    %c0_i32 = arith.constant 0 : i32
    %c0_i32_0 = arith.constant 0 : i32
    return %arg0, %c0_i32 : i32, i32
  }
}

</mosaic_0001>

<bundles_post_ra>
// kernel: atari_pgn_forward.4
= control target key start
LH: loop header
LB: loop body
LE: loop exit
PB: predicated region body
PF: predicated region fallthrough
CT: control target
= control target key end

     0   :  { %vm423_vm0 = vcmask 257024   ;;  %s830_s1 = inlined_call_operand.vmem [shape: bf16[256,32], index: 1, kind: input, shape index: {}]   ;;  %s831_s0 = inlined_call_operand.vmem [shape: bf16[128,256], index: 0, kind: input, shape index: {}]   ;;  %s832_s2 = inlined_call_operand.vmem [shape: f32[1,32], index: 2, kind: input, shape index: {}]   ;;  %s833_s3 = inlined_call_operand.vmem [shape: bf16[128,32], index: 3, kind: output, shape index: {}]  }
   0x1   :  { %v589_v0 = vld [vmem:[%s830_s1 + $0x40] sm:$0xff]   ;;  %v591_v2 = vld [vmem:[%s830_s1 + $0x48] sm:$0xff]   ;;  %v593_v4 = vld [vmem:[%s830_s1 + $0x50] sm:$0xff]  }
   0x2   :  { %v590_v1 = vld [vmem:[%s830_s1] sm:$0xff]   ;;  %509 = vmatprep.subr.bf16.mxu0 %v589_v0  ;;  %573 = vmatprep.subr.bf16.mxu1 %v589_v0  ;;  %v592_v3 = vld [vmem:[%s830_s1 + $0x8] sm:$0xff]   ;;  %v594_v5 = vld [vmem:[%s830_s1 + $0x10] sm:$0xff]  }
   0x3   :  { %510 = vmatpush3.bf16.msra.mxu0 %v590_v1  ;;  %581 = vmatpush3.bf16.msra.mxu1 %v590_v1  ;;  %v595_v6 = vld [vmem:[%s830_s1 + $0x58] sm:$0xff]   ;;  %v597_v8 = vld [vmem:[%s830_s1 + $0x60] sm:$0xff]   ;;  %v599_v10 = vld [vmem:[%s830_s1 + $0x68] sm:$0xff]  }
   0x4   :  { %511 = vmatprep.subr.bf16.mxu0 %v591_v2  ;;  %574 = vmatprep.subr.bf16.mxu1 %v591_v2  ;;  %v596_v7 = vld [vmem:[%s830_s1 + $0x18] sm:$0xff]   ;;  %v598_v9 = vld [vmem:[%s830_s1 + $0x20] sm:$0xff]   ;;  %v600_v13 = vld [vmem:[%s830_s1 + $0x28] sm:$0xff]  }
   0x5   :  { %v607_v11 = vld [vmem:[%s831_s0 + $0x4] ss:$8 sps:$4 sm:$0xff]   ;;  %v601_v14 = vld [vmem:[%s830_s1 + $0x70] sm:$0xff]   ;;  %v603_v16 = vld [vmem:[%s830_s1 + $0x78] sm:$0xff]  }
   0x6   :  { %v610_v12 = vld [vmem:[%s831_s0 + $0x44] ss:$8 sps:$4 sm:$0xff]   ;;  %278 = vmatprep.mubr.bf16.mxu0 %v607_v11  ;;  %v602_v15 = vld [vmem:[%s830_s1 + $0x30] sm:$0xff]   ;;  %v604_v17 = vld [vmem:[%s830_s1 + $0x38] sm:$0xff]  }
   0x7   :  { %512 = vmatpush3.bf16.msra.mxu0 %v592_v3  ;;  %582 = vmatpush3.bf16.msra.mxu1 %v592_v3  ;;  %v605_v18 = vld [vmem:[%s831_s0] ss:$8 sps:$4 sm:$0xff]   ;;  %v611_v20 = vld [vmem:[%s831_s0 + $0x14] ss:$8 sps:$4 sm:$0xff]   ;;  %v615_v22 = vld [vmem:[%s831_s0 + $0x10] ss:$8 sps:$4 sm:$0xff]  }
   0x8   :  { %513 = vmatprep.subr.bf16.mxu0 %v593_v4  ;;  %575 = vmatprep.subr.bf16.mxu1 %v593_v4  ;;  %v608_v19 = vld [vmem:[%s831_s0 + $0x40] ss:$8 sps:$4 sm:$0xff]   ;;  %v613_v21 = vld [vmem:[%s831_s0 + $0x54] ss:$8 sps:$4 sm:$0xff]   ;;  %v616_v23 = vld [vmem:[%s831_s0 + $0x50] ss:$8 sps:$4 sm:$0xff]  }
   0x9   :  { %310 = vmatprep.mubr.bf16.mxu1 %v610_v12  ;;  %v617_v24 = vld [vmem:[%s831_s0 + $0x24] ss:$8 sps:$4 sm:$0xff]   ;;  %v621_v26 = vld [vmem:[%s831_s0 + $0x20] ss:$8 sps:$4 sm:$0xff]   ;;  %v623_v28 = vld [vmem:[%s831_s0 + $0x34] ss:$8 sps:$4 sm:$0xff]  }
   0xa   :  { %v619_v25 = vld [vmem:[%s831_s0 + $0x64] ss:$8 sps:$4 sm:$0xff]   ;;  %v622_v27 = vld [vmem:[%s831_s0 + $0x60] ss:$8 sps:$4 sm:$0xff]   ;;  %v625_v29 = vld [vmem:[%s831_s0 + $0x74] ss:$8 sps:$4 sm:$0xff]  }
   0xb   :  { %514 = vmatpush3.bf16.msra.mxu0 %v594_v5  ;;  %583 = vmatpush3.bf16.msra.mxu1 %v594_v5  ;;  %v627_v30 = vld [vmem:[%s831_s0 + $0x30] ss:$8 sps:$4 sm:$0xff]   ;;  %v748_v34 = vld [vmem:[%s832_s2] ss:$0 sm:$0xff] }
   0xc   :  { %515 = vmatprep.subr.bf16.mxu0 %v595_v6  ;;  %576 = vmatprep.subr.bf16.mxu1 %v595_v6  ;;  %v628_v31 = vld [vmem:[%s831_s0 + $0x70] ss:$8 sps:$4 sm:$0xff]  }
   0xf   :  { %516 = vmatpush3.bf16.msra.mxu0 %v596_v7  ;;  %584 = vmatpush3.bf16.msra.mxu1 %v596_v7 }
  0x10   :  { %517 = vmatprep.subr.bf16.mxu0 %v597_v8  ;;  %577 = vmatprep.subr.bf16.mxu1 %v597_v8 }
  0x13   :  { %518 = vmatpush3.bf16.msra.mxu0 %v598_v9  ;;  %585 = vmatpush3.bf16.msra.mxu1 %v598_v9 }
  0x14   :  { %519 = vmatprep.subr.bf16.mxu0 %v599_v10  ;;  %578 = vmatprep.subr.bf16.mxu1 %v599_v10 }
  0x17   :  { %520 = vmatpush3.bf16.msra.mxu0 %v600_v13  ;;  %586 = vmatpush3.bf16.msra.mxu1 %v600_v13 }
  0x18   :  { %521 = vmatprep.subr.bf16.mxu0 %v601_v14  ;;  %579 = vmatprep.subr.bf16.mxu1 %v601_v14 }
  0x1b   :  { %522 = vmatpush3.bf16.msra.mxu0 %v602_v15  ;;  %587 = vmatpush3.bf16.msra.mxu1 %v602_v15 }
  0x1c   :  { %523 = vmatprep.subr.bf16.mxu0 %v603_v16  ;;  %580 = vmatprep.subr.bf16.mxu1 %v603_v16 }
  0x1f   :  { %524 = vmatpush3.bf16.msra.mxu0 %v604_v17  ;;  %588 = vmatpush3.bf16.msra.mxu1 %v604_v17 }
  0x22   :  { %279 = vmatmul.mubr.bf16.vlgmr.msra.gmra.mrb[0].mxu0 %v605_v18  ;;  %311 = vmatmul.mubr.bf16.vlgmr.msra.gmra.mrb[0].mxu1 %v608_v19 }
  0x23   :  { %286 = vmatprep.mubr.bf16.mxu0 %v611_v20  ;;  %318 = vmatprep.mubr.bf16.mxu1 %v613_v21 }
  0x2a   :  { %287 = vmatmul.mubr.bf16.gmra.mrb[4].mxu0 %v615_v22  ;;  %319 = vmatmul.mubr.bf16.gmra.mrb[4].mxu1 %v616_v23 }
  0x2b   :  { %294 = vmatprep.mubr.bf16.mxu0 %v617_v24  ;;  %326 = vmatprep.mubr.bf16.mxu1 %v619_v25 }
  0x32   :  { %295 = vmatmul.mubr.bf16.gmra.mrb[8].mxu0 %v621_v26  ;;  %327 = vmatmul.mubr.bf16.gmra.mrb[8].mxu1 %v622_v27 }
  0x33   :  { %302 = vmatprep.mubr.bf16.mxu0 %v623_v28  ;;  %334 = vmatprep.mubr.bf16.mxu1 %v625_v29 }
  0x3a   :  { %303 = vmatmul.mubr.bf16.gmra.mrb[12].mxu0 %v627_v30  ;;  %335 = vmatmul.mubr.bf16.gmra.mrb[12].mxu1 %v628_v31 }
  0xf5   :  { %v525_v32 = vpop.f32.mrb[0].mxu0  ;;  %v549_v33 = vpop.f32.mrb[0].mxu1 }
  0xf6   :  { %v526_v35 = vpop.f32.mrb[1].mxu0  ;;  %v550_v36 = vpop.f32.mrb[1].mxu1 }
  0xf7   :  { %v527_v37 = vadd.f32 %v526_v35, %v525_v32  ;;  %v551_v38 = vadd.f32 %v550_v36, %v549_v33  ;;  %v528_v39 = vpop.f32.mrb[2].mxu0  ;;  %v552_v40 = vpop.f32.mrb[2].mxu1 }
  0xf8   :  { %v529_v41 = vpop.f32.mrb[3].mxu0  ;;  %v553_v42 = vpop.f32.mrb[3].mxu1 }
  0xf9   :  { %v281_v43 = vadd.f32 %v527_v37, %v748_v34  ;;  %v313_v44 = vadd.f32 %v551_v38, %v748_v34  ;;  %v530_v45 = vadd.f32 %v529_v41, %v528_v39  ;;  %v554_v46 = vadd.f32 %v553_v42, %v552_v40 }
  0xfb   :  { %v343_v47 = vmax.f32 %v281_v43, 0.0  ;;  %v351_v48 = vmax.f32 %v313_v44, 0.0  ;;  %v284_v49 = vadd.f32 %v530_v45, %v748_v34  ;;  %v316_v50 = vadd.f32 %v554_v46, %v748_v34 }
  0xfd   :  { %v493_v51 = vpack.c.bf16 %v343_v47, %v343_v47  ;;  %v501_v52 = vpack.c.bf16 %v351_v48, %v351_v48  ;;  %v344_v53 = vmax.f32 %v284_v49, 0.0  ;;  %v352_v54 = vmax.f32 %v316_v50, 0.0  ;;  %v531_v55 = vpop.f32.mrb[4].mxu0  ;;  %v555_v56 = vpop.f32.mrb[4].mxu1 }
  0xfe   :  { %v532_v57 = vpop.f32.mrb[5].mxu0  ;;  %v556_v58 = vpop.f32.mrb[5].mxu1 }
  0xff   :  { %424 = vst.msk [vmem:[%s833_s3] sm:$0xf] %vm423_vm0, %v493_v51  ;;  %432 = vst.msk [vmem:[%s833_s3 + $0x20] sm:$0xf] %vm423_vm0, %v501_v52  ;;  %v494_v59 = vpack.c.bf16 %v344_v53, %v344_v53  ;;  %v502_v60 = vpack.c.bf16 %v352_v54, %v352_v54  ;;  %v533_v61 = vadd.f32 %v532_v57, %v531_v55  ;;  %v534_v63 = vpop.f32.mrb[6].mxu0  ;;  %v558_v0 = vpop.f32.mrb[6].mxu1 }
 0x100   :  { %v557_v62 = vadd.f32 %v556_v58, %v555_v56  ;;  %v535_v1 = vpop.f32.mrb[7].mxu0  ;;  %v559_v2 = vpop.f32.mrb[7].mxu1 }
 0x101   :  { %425 = vst.msk [vmem:[%s833_s3 + $0x4] sm:$0xf] %vm423_vm0, %v494_v59  ;;  %433 = vst.msk [vmem:[%s833_s3 + $0x24] sm:$0xf] %vm423_vm0, %v502_v60  ;;  %v289_v3 = vadd.f32 %v533_v61, %v748_v34  ;;  %v536_v5 = vadd.f32 %v535_v1, %v534_v63  ;;  %v560_v6 = vadd.f32 %v559_v2, %v558_v0 }
 0x102   :  { %v321_v4 = vadd.f32 %v557_v62, %v748_v34 }
 0x103   :  { %v345_v7 = vmax.f32 %v289_v3, 0.0  ;;  %v292_v9 = vadd.f32 %v536_v5, %v748_v34  ;;  %v324_v10 = vadd.f32 %v560_v6, %v748_v34 }
 0x104   :  { %v353_v8 = vmax.f32 %v321_v4, 0.0 }
 0x105   :  { %v495_v11 = vpack.c.bf16 %v345_v7, %v345_v7  ;;  %v346_v13 = vmax.f32 %v292_v9, 0.0  ;;  %v354_v14 = vmax.f32 %v324_v10, 0.0  ;;  %v537_v15 = vpop.f32.mrb[8].mxu0  ;;  %v561_v16 = vpop.f32.mrb[8].mxu1 }
 0x106   :  { %v503_v12 = vpack.c.bf16 %v353_v8, %v353_v8  ;;  %v538_v17 = vpop.f32.mrb[9].mxu0  ;;  %v562_v18 = vpop.f32.mrb[9].mxu1 }
 0x107   :  { %426 = vst.msk [vmem:[%s833_s3 + $0x8] sm:$0xf] %vm423_vm0, %v495_v11  ;;  %v496_v19 = vpack.c.bf16 %v346_v13, %v346_v13  ;;  %v504_v20 = vpack.c.bf16 %v354_v14, %v354_v14  ;;  %v539_v21 = vadd.f32 %v538_v17, %v537_v15  ;;  %v563_v22 = vadd.f32 %v562_v18, %v561_v16  ;;  %v540_v23 = vpop.f32.mrb[10].mxu0  ;;  %v564_v24 = vpop.f32.mrb[10].mxu1 }
 0x108   :  { %434 = vst.msk [vmem:[%s833_s3 + $0x28] sm:$0xf] %vm423_vm0, %v503_v12  ;;  %v541_v25 = vpop.f32.mrb[11].mxu0  ;;  %v565_v26 = vpop.f32.mrb[11].mxu1 }
 0x109   :  { %427 = vst.msk [vmem:[%s833_s3 + $0xc] sm:$0xf] %vm423_vm0, %v496_v19  ;;  %435 = vst.msk [vmem:[%s833_s3 + $0x2c] sm:$0xf] %vm423_vm0, %v504_v20  ;;  %v297_v27 = vadd.f32 %v539_v21, %v748_v34  ;;  %v329_v28 = vadd.f32 %v563_v22, %v748_v34  ;;  %v542_v29 = vadd.f32 %v541_v25, %v540_v23 }
 0x10a   :  { %v566_v30 = vadd.f32 %v565_v26, %v564_v24 }
 0x10b   :  { %v347_v31 = vmax.f32 %v297_v27, 0.0  ;;  %v355_v32 = vmax.f32 %v329_v28, 0.0  ;;  %v300_v33 = vadd.f32 %v542_v29, %v748_v34 }
 0x10c   :  { %v332_v35 = vadd.f32 %v566_v30, %v748_v34 }
 0x10d   :  { %v497_v36 = vpack.c.bf16 %v347_v31, %v347_v31  ;;  %v505_v37 = vpack.c.bf16 %v355_v32, %v355_v32  ;;  %v348_v38 = vmax.f32 %v300_v33, 0.0  ;;  %v543_v40 = vpop.f32.mrb[12].mxu0  ;;  %v567_v41 = vpop.f32.mrb[12].mxu1 }
 0x10e   :  { %v356_v39 = vmax.f32 %v332_v35, 0.0  ;;  %v544_v42 = vpop.f32.mrb[13].mxu0  ;;  %v568_v43 = vpop.f32.mrb[13].mxu1 }
 0x10f   :  { %428 = vst.msk [vmem:[%s833_s3 + $0x10] sm:$0xf] %vm423_vm0, %v497_v36  ;;  %436 = vst.msk [vmem:[%s833_s3 + $0x30] sm:$0xf] %vm423_vm0, %v505_v37  ;;  %v498_v44 = vpack.c.bf16 %v348_v38, %v348_v38  ;;  %v545_v46 = vadd.f32 %v544_v42, %v543_v40  ;;  %v569_v47 = vadd.f32 %v568_v43, %v567_v41  ;;  %v546_v48 = vpop.f32.mrb[14].mxu0  ;;  %v570_v49 = vpop.f32.mrb[14].mxu1 }
 0x110   :  { %v506_v45 = vpack.c.bf16 %v356_v39, %v356_v39  ;;  %v547_v50 = vpop.f32.mrb[15].mxu0  ;;  %v571_v51 = vpop.f32.mrb[15].mxu1 }
 0x111   :  { %429 = vst.msk [vmem:[%s833_s3 + $0x14] sm:$0xf] %vm423_vm0, %v498_v44  ;;  %v305_v52 = vadd.f32 %v545_v46, %v748_v34  ;;  %v337_v53 = vadd.f32 %v569_v47, %v748_v34  ;;  %v548_v54 = vadd.f32 %v547_v50, %v546_v48  ;;  %v572_v55 = vadd.f32 %v571_v51, %v570_v49 }
 0x112   :  { %437 = vst.msk [vmem:[%s833_s3 + $0x34] sm:$0xf] %vm423_vm0, %v506_v45 }
 0x113   :  { %v349_v56 = vmax.f32 %v305_v52, 0.0  ;;  %v357_v57 = vmax.f32 %v337_v53, 0.0  ;;  %v308_v58 = vadd.f32 %v548_v54, %v748_v34  ;;  %v340_v59 = vadd.f32 %v572_v55, %v748_v34 }
 0x115   :  { %v499_v60 = vpack.c.bf16 %v349_v56, %v349_v56  ;;  %v507_v61 = vpack.c.bf16 %v357_v57, %v357_v57  ;;  %v350_v62 = vmax.f32 %v308_v58, 0.0  ;;  %v358_v63 = vmax.f32 %v340_v59, 0.0 }
 0x117   :  { %430 = vst.msk [vmem:[%s833_s3 + $0x18] sm:$0xf] %vm423_vm0, %v499_v60  ;;  %438 = vst.msk [vmem:[%s833_s3 + $0x38] sm:$0xf] %vm423_vm0, %v507_v61  ;;  %v500_v0 = vpack.c.bf16 %v350_v62, %v350_v62  ;;  %v508_v1 = vpack.c.bf16 %v358_v63, %v358_v63 }
 0x119   :  { %431 = vst.msk [vmem:[%s833_s3 + $0x1c] sm:$0xf] %vm423_vm0, %v500_v0  ;;  %439 = vst.msk [vmem:[%s833_s3 + $0x3c] sm:$0xf] %vm423_vm0, %v508_v1 }

// kernel: atari_pgn_forward.5
= control target key start
LH: loop header
LB: loop body
LE: loop exit
PB: predicated region body
PF: predicated region fallthrough
CT: control target
= control target key end

     0   :  { %vm430_vm0 = vcmask 519168   ;;  %s732_s1 = inlined_call_operand.vmem [shape: bf16[512,64], index: 1, kind: input, shape index: {}]   ;;  %s733_s0 = inlined_call_operand.vmem [shape: bf16[24,512], index: 0, kind: input, shape index: {}]   ;;  %s734_s2 = inlined_call_operand.vmem [shape: f32[1,64], index: 2, kind: input, shape index: {}]   ;;  %s735_s3 = inlined_call_operand.vmem [shape: bf16[24,64], index: 3, kind: output, shape index: {}]  }
   0x1   :  { %v541_v0 = vld [vmem:[%s732_s1 + $0x40] sm:$0xff]   ;;  %v545_v4 = vld [vmem:[%s732_s1 + $0x48] sm:$0xff]   ;;  %v549_v8 = vld [vmem:[%s732_s1 + $0x50] sm:$0xff]  }
   0x2   :  { %v542_v1 = vld [vmem:[%s732_s1 + $0xc0] sm:$0xff]   ;;  %485 = vmatprep.subr.bf16.mxu0 %v541_v0  ;;  %v546_v5 = vld [vmem:[%s732_s1 + $0xc8] sm:$0xff]   ;;  %v550_v9 = vld [vmem:[%s732_s1 + $0xd0] sm:$0xff]  }
   0x3   :  { %v543_v2 = vld [vmem:[%s732_s1] sm:$0xff]   ;;  %513 = vmatprep.subr.bf16.mxu1 %v542_v1  ;;  %v547_v6 = vld [vmem:[%s732_s1 + $0x8] sm:$0xff]   ;;  %v551_v10 = vld [vmem:[%s732_s1 + $0x10] sm:$0xff]  }
   0x4   :  { %v544_v3 = vld [vmem:[%s732_s1 + $0x80] sm:$0xff]   ;;  %486 = vmatpush3.bf16.msra.mxu0 %v543_v2  ;;  %v548_v7 = vld [vmem:[%s732_s1 + $0x88] sm:$0xff]   ;;  %v552_v11 = vld [vmem:[%s732_s1 + $0x90] sm:$0xff]  }
   0x5   :  { %514 = vmatpush3.bf16.msra.mxu1 %v544_v3  ;;  %487 = vmatprep.subr.bf16.mxu0 %v545_v4  ;;  %v553_v12 = vld [vmem:[%s732_s1 + $0x58] sm:$0xff]   ;;  %v557_v16 = vld [vmem:[%s732_s1 + $0x60] sm:$0xff]   ;;  %v561_v20 = vld [vmem:[%s732_s1 + $0x68] sm:$0xff]  }
   0x6   :  { %515 = vmatprep.subr.bf16.mxu1 %v546_v5  ;;  %v554_v13 = vld [vmem:[%s732_s1 + $0xd8] sm:$0xff]   ;;  %v558_v17 = vld [vmem:[%s732_s1 + $0xe0] sm:$0xff]   ;;  %v562_v21 = vld [vmem:[%s732_s1 + $0xe8] sm:$0xff]  }
   0x7   :  { %v555_v14 = vld [vmem:[%s732_s1 + $0x18] sm:$0xff]   ;;  %v559_v18 = vld [vmem:[%s732_s1 + $0x20] sm:$0xff]   ;;  %v563_v22 = vld [vmem:[%s732_s1 + $0x28] sm:$0xff]  }
   0x8   :  { %488 = vmatpush3.bf16.msra.mxu0 %v547_v6  ;;  %v556_v15 = vld [vmem:[%s732_s1 + $0x98] sm:$0xff]   ;;  %v560_v19 = vld [vmem:[%s732_s1 + $0xa0] sm:$0xff]   ;;  %v564_v23 = vld [vmem:[%s732_s1 + $0xa8] sm:$0xff]  }
   0x9   :  { %516 = vmatpush3.bf16.msra.mxu1 %v548_v7  ;;  %489 = vmatprep.subr.bf16.mxu0 %v549_v8  ;;  %v565_v24 = vld [vmem:[%s732_s1 + $0x70] sm:$0xff]   ;;  %v569_v28 = vld [vmem:[%s732_s1 + $0x78] sm:$0xff]   ;;  %v19_v36 = vld [vmem:[%s733_s0 + $0x20] sm:$0xff] }
   0xa   :  { %517 = vmatprep.subr.bf16.mxu1 %v550_v9  ;;  %v566_v25 = vld [vmem:[%s732_s1 + $0xf0] sm:$0xff]   ;;  %v570_v29 = vld [vmem:[%s732_s1 + $0xf8] sm:$0xff]   ;;  %v444_v37 = vcombine.high %v19_v36, %v19_v36  ;;  %v20_v38 = vld [vmem:[%s733_s0 + $0x28] sm:$0xff]  ;;  %v443_v40 = vcombine.low %v19_v36, %v19_v36 }
   0xb   :  { %v567_v26 = vld [vmem:[%s732_s1 + $0x30] sm:$0xff]   ;;  %v571_v30 = vld [vmem:[%s732_s1 + $0x38] sm:$0xff]   ;;  %v446_v39 = vcombine.high %v20_v38, %v20_v38  ;;  %v445_v41 = vcombine.low %v20_v38, %v20_v38  ;;  %v438_v44 = vld [vmem:[%s734_s2] ss:$0 sm:$0xff] }
   0xc   :  { %490 = vmatpush3.bf16.msra.mxu0 %v551_v10  ;;  %v568_v27 = vld [vmem:[%s732_s1 + $0xb0] sm:$0xff]   ;;  %v572_v31 = vld [vmem:[%s732_s1 + $0xb8] sm:$0xff]  }
   0xd   :  { %518 = vmatpush3.bf16.msra.mxu1 %v552_v11  ;;  %491 = vmatprep.subr.bf16.mxu0 %v553_v12  ;;  %v573_v32 = vld [vmem:[%s733_s0] ss:$16 sps:$4 sm:$0xff]   ;;  %v575_v33 = vld [vmem:[%s733_s0 + $0x4] ss:$16 sps:$4 sm:$0xff]   ;;  %v576_v34 = vld [vmem:[%s733_s0 + $0x8] ss:$16 sps:$4 sm:$0xff]  }
   0xe   :  { %519 = vmatprep.subr.bf16.mxu1 %v554_v13  ;;  %v578_v35 = vld [vmem:[%s733_s0 + $0xc] ss:$16 sps:$4 sm:$0xff]   ;;  %350 = vmatprep.mubr.bf16.mxu0 %v575_v33 }
   0xf   :  { %398 = vmatprep.mubr.bf16.mxu1 %v578_v35 }
  0x10   :  { %492 = vmatpush3.bf16.msra.mxu0 %v555_v14 }
  0x11   :  { %520 = vmatpush3.bf16.msra.mxu1 %v556_v15  ;;  %493 = vmatprep.subr.bf16.mxu0 %v557_v16 }
  0x12   :  { %521 = vmatprep.subr.bf16.mxu1 %v558_v17 }
  0x14   :  { %494 = vmatpush3.bf16.msra.mxu0 %v559_v18 }
  0x15   :  { %522 = vmatpush3.bf16.msra.mxu1 %v560_v19  ;;  %495 = vmatprep.subr.bf16.mxu0 %v561_v20 }
  0x16   :  { %523 = vmatprep.subr.bf16.mxu1 %v562_v21 }
  0x18   :  { %496 = vmatpush3.bf16.msra.mxu0 %v563_v22 }
  0x19   :  { %524 = vmatpush3.bf16.msra.mxu1 %v564_v23  ;;  %497 = vmatprep.subr.bf16.mxu0 %v565_v24 }
  0x1a   :  { %525 = vmatprep.subr.bf16.mxu1 %v566_v25 }
  0x1c   :  { %498 = vmatpush3.bf16.msra.mxu0 %v567_v26 }
  0x1d   :  { %526 = vmatpush3.bf16.msra.mxu1 %v568_v27  ;;  %499 = vmatprep.subr.bf16.mxu0 %v569_v28 }
  0x1e   :  { %527 = vmatprep.subr.bf16.mxu1 %v570_v29 }
  0x20   :  { %500 = vmatpush3.bf16.msra.mxu0 %v571_v30 }
  0x21   :  { %528 = vmatpush3.bf16.msra.mxu1 %v572_v31 }
  0x23   :  { %351 = vmatmul.mubr.bf16.vlgmr.msra.gmra.mrb[0].mxu0 %v573_v32 }
  0x24   :  { %399 = vmatmul.mubr.bf16.vlgmr.msra.gmra.mrb[0].mxu1 %v576_v34  ;;  %358 = vmatprep.mubr.bf16.mxu0 %v444_v37 }
  0x25   :  { %406 = vmatprep.mubr.bf16.mxu1 %v446_v39 }
  0x2b   :  { %359 = vmatmul.mubr.bf16.gmra.mrb[4].mxu0 %v443_v40 }
  0x2c   :  { %407 = vmatmul.mubr.bf16.gmra.mrb[4].mxu1 %v445_v41 }
  0xf6   :  { %v501_v42 = vpop.f32.mrb[0].mxu0 }
  0xf7   :  { %v529_v43 = vpop.f32.mrb[0].mxu1  ;;  %v502_v45 = vpop.f32.mrb[1].mxu0 }
  0xf8   :  { %v503_v46 = vadd.f32 %v502_v45, %v501_v42  ;;  %v530_v47 = vpop.f32.mrb[1].mxu1  ;;  %v504_v48 = vpop.f32.mrb[2].mxu0 }
  0xf9   :  { %v531_v49 = vadd.f32 %v530_v47, %v529_v43  ;;  %v532_v50 = vpop.f32.mrb[2].mxu1  ;;  %v505_v51 = vpop.f32.mrb[3].mxu0 }
  0xfa   :  { %v353_v52 = vadd.f32 %v503_v46, %v438_v44  ;;  %v506_v53 = vadd.f32 %v505_v51, %v504_v48  ;;  %v533_v54 = vpop.f32.mrb[3].mxu1 }
  0xfb   :  { %v534_v55 = vadd.f32 %v533_v54, %v532_v50 }
  0xfc   :  { %v401_v56 = vadd.f32 %v531_v49, %v353_v52  ;;  %v356_v57 = vadd.f32 %v506_v53, %v438_v44 }
  0xfe   :  { %v414_v58 = vmax.f32 %v401_v56, 0.0  ;;  %v404_v59 = vadd.f32 %v534_v55, %v356_v57  ;;  %v507_v60 = vpop.f32.mrb[4].mxu0 }
  0xff   :  { %v535_v61 = vpop.f32.mrb[4].mxu1  ;;  %v508_v62 = vpop.f32.mrb[5].mxu0 }
 0x100   :  { %v482_v63 = vpack.c.bf16 %v414_v58, %v414_v58  ;;  %v415_v0 = vmax.f32 %v404_v59, 0.0  ;;  %v509_v1 = vadd.f32 %v508_v62, %v507_v60  ;;  %v536_v2 = vpop.f32.mrb[5].mxu1  ;;  %v510_v3 = vpop.f32.mrb[6].mxu0 }
 0x101   :  { %v537_v4 = vadd.f32 %v536_v2, %v535_v61  ;;  %v538_v5 = vpop.f32.mrb[6].mxu1  ;;  %v511_v6 = vpop.f32.mrb[7].mxu0 }
 0x102   :  { %431 = vst.msk [vmem:[%s735_s3] sm:$0xf] %vm430_vm0, %v482_v63  ;;  %v483_v7 = vpack.c.bf16 %v415_v0, %v415_v0  ;;  %v361_v8 = vadd.f32 %v509_v1, %v438_v44  ;;  %v539_v9 = vpop.f32.mrb[7].mxu1 }
 0x104   :  { %432 = vst.msk [vmem:[%s735_s3 + $0x4] sm:$0xf] %vm430_vm0, %v483_v7  ;;  %v409_v10 = vadd.f32 %v537_v4, %v361_v8 }
 0x106   :  { %v416_v11 = vmax.f32 %v409_v10, 0.0 }
 0x108   :  { %v484_v12 = vpack.c.bf16 %v416_v11, %v416_v11 }
 0x10a   :  { %433 = vst.msk [vmem:[%s735_s3 + $0x8] sm:$0xf] %vm430_vm0, %v484_v12 }

// kernel: atari_pgn_forward.6
= control target key start
LH: loop header
LB: loop body
LE: loop exit
PB: predicated region body
PF: predicated region fallthrough
CT: control target
= control target key end

     0   :  { %v609_v35 = vmov 0.0   ;;  %vm610_vm0 = vmmov 0   ;;  %vm330_vm1 = vcmask 523264   ;;  %vm456_vm2 = vcmask 519168   ;;  %s754_s1 = inlined_call_operand.vmem [shape: bf16[576,64], index: 1, kind: input, shape index: {}]   ;;  %s755_s0 = inlined_call_operand.vmem [shape: bf16[8,576], index: 0, kind: input, shape index: {}]   ;;  %s756_s2 = inlined_call_operand.vmem [shape: f32[1,64], index: 2, kind: input, shape index: {}]   ;;  %s757_s3 = inlined_call_operand.vmem [shape: bf16[8,64], index: 3, kind: output, shape index: {}]  }
   0x1   :  { %v568_v0 = vld [vmem:[%s754_s1 + $0x40] sm:$0xff]   ;;  %v572_v4 = vld [vmem:[%s754_s1 + $0x48] sm:$0xff]   ;;  %v576_v8 = vld [vmem:[%s754_s1 + $0x50] sm:$0xff]  }
   0x2   :  { %v569_v1 = vld [vmem:[%s754_s1] sm:$0xff]   ;;  %505 = vmatprep.subr.bf16.mxu0 %v568_v0  ;;  %v573_v5 = vld [vmem:[%s754_s1 + $0x8] sm:$0xff]   ;;  %v577_v9 = vld [vmem:[%s754_s1 + $0x10] sm:$0xff]  }
   0x3   :  { %v570_v2 = vld [vmem:[%s754_s1 + $0xc0] sm:$0xff]   ;;  %506 = vmatpush3.bf16.msra.mxu0 %v569_v1  ;;  %v574_v6 = vld [vmem:[%s754_s1 + $0xc8] sm:$0xff]   ;;  %v578_v10 = vld [vmem:[%s754_s1 + $0xd0] sm:$0xff]  }
   0x4   :  { %v571_v3 = vld [vmem:[%s754_s1 + $0x80] sm:$0xff]   ;;  %527 = vmatprep.subr.bf16.mxu1 %v570_v2  ;;  %507 = vmatprep.subr.bf16.mxu0 %v572_v4  ;;  %v575_v7 = vld [vmem:[%s754_s1 + $0x88] sm:$0xff]   ;;  %v579_v11 = vld [vmem:[%s754_s1 + $0x90] sm:$0xff]  }
   0x5   :  { %528 = vmatpush3.bf16.msra.mxu1 %v571_v3  ;;  %v580_v12 = vld [vmem:[%s754_s1 + $0x58] sm:$0xff]   ;;  %v584_v16 = vld [vmem:[%s754_s1 + $0x60] sm:$0xff]   ;;  %v588_v20 = vld [vmem:[%s754_s1 + $0x68] sm:$0xff]  }
   0x6   :  { %529 = vmatprep.subr.bf16.mxu1 %v574_v6  ;;  %v581_v13 = vld [vmem:[%s754_s1 + $0x18] sm:$0xff]   ;;  %v585_v17 = vld [vmem:[%s754_s1 + $0x20] sm:$0xff]   ;;  %v589_v21 = vld [vmem:[%s754_s1 + $0x28] sm:$0xff]  }
   0x7   :  { %508 = vmatpush3.bf16.msra.mxu0 %v573_v5  ;;  %v582_v14 = vld [vmem:[%s754_s1 + $0xd8] sm:$0xff]   ;;  %v586_v18 = vld [vmem:[%s754_s1 + $0xe0] sm:$0xff]   ;;  %v590_v22 = vld [vmem:[%s754_s1 + $0xe8] sm:$0xff]  }
   0x8   :  { %509 = vmatprep.subr.bf16.mxu0 %v576_v8  ;;  %v583_v15 = vld [vmem:[%s754_s1 + $0x98] sm:$0xff]   ;;  %v587_v19 = vld [vmem:[%s754_s1 + $0xa0] sm:$0xff]   ;;  %v591_v23 = vld [vmem:[%s754_s1 + $0xa8] sm:$0xff]  }
   0x9   :  { %530 = vmatpush3.bf16.msra.mxu1 %v575_v7  ;;  %v592_v24 = vld [vmem:[%s754_s1 + $0x70] sm:$0xff]   ;;  %v596_v28 = vld [vmem:[%s754_s1 + $0x78] sm:$0xff]   ;;  %v15_v31 = vld [vmem:[%s755_s0] sm:$0xff] }
   0xa   :  { %531 = vmatprep.subr.bf16.mxu1 %v578_v10  ;;  %v593_v25 = vld [vmem:[%s754_s1 + $0x30] sm:$0xff]   ;;  %v597_v29 = vld [vmem:[%s754_s1 + $0x38] sm:$0xff]   ;;  %v463_v32 = vcombine.low %v15_v31, %v15_v31  ;;  %v464_v33 = vcombine.high %v15_v31, %v15_v31  ;;  %v16_v36 = vld [vmem:[%s755_s0 + $0x8] sm:$0xff] }
   0xb   :  { %510 = vmatpush3.bf16.msra.mxu0 %v577_v9  ;;  %v594_v26 = vld [vmem:[%s754_s1 + $0xf0] sm:$0xff]   ;;  %v598_v30 = vld [vmem:[%s754_s1 + $0xf8] sm:$0xff]   ;;  %v465_v37 = vcombine.low %v16_v36, %v16_v36  ;;  %v466_v38 = vcombine.high %v16_v36, %v16_v36  ;;  %v605_v39 = vld [vmem:[%s754_s1 + $0x100] sm:$0xff]  }
   0xc   :  { %511 = vmatprep.subr.bf16.mxu0 %v580_v12  ;;  %v595_v27 = vld [vmem:[%s754_s1 + $0xb0] sm:$0xff]   ;;  %v602_v34 = vld [vmem:[%s754_s1 + $0xb8] sm:$0xff]   ;;  %366 = vmatprep.mubr.bf16.mxu0 %v464_v33  ;;  %v606_v40 = vld [vmem:[%s754_s1 + $0x108] sm:$0xff]  }
   0xd   :  { %532 = vmatpush3.bf16.msra.mxu1 %v579_v11  ;;  %406 = vmatprep.mubr.bf16.mxu1 %v466_v38  ;;  %v607_v41 = vld [vmem:[%s754_s1 + $0x110] sm:$0xff]   ;;  %v608_v42 = vld [vmem:[%s754_s1 + $0x118] sm:$0xff]   ;;  %v462_v45 = vld [vmem:[%s756_s2] ss:$0 sm:$0xff] }
   0xe   :  { %533 = vmatprep.subr.bf16.mxu1 %v582_v14  ;;  %v601_v43 = vld [vmem:[%s755_s0 + $0x10] ss:$0 sps:$4 sm:$0xff]  }
   0xf   :  { %512 = vmatpush3.bf16.msra.mxu0 %v581_v13 }
  0x10   :  { %513 = vmatprep.subr.bf16.mxu0 %v584_v16 }
  0x11   :  { %534 = vmatpush3.bf16.msra.mxu1 %v583_v15 }
  0x12   :  { %535 = vmatprep.subr.bf16.mxu1 %v586_v18 }
  0x13   :  { %514 = vmatpush3.bf16.msra.mxu0 %v585_v17 }
  0x14   :  { %515 = vmatprep.subr.bf16.mxu0 %v588_v20 }
  0x15   :  { %536 = vmatpush3.bf16.msra.mxu1 %v587_v19 }
  0x16   :  { %537 = vmatprep.subr.bf16.mxu1 %v590_v22 }
  0x17   :  { %516 = vmatpush3.bf16.msra.mxu0 %v589_v21 }
  0x18   :  { %517 = vmatprep.subr.bf16.mxu0 %v592_v24 }
  0x19   :  { %538 = vmatpush3.bf16.msra.mxu1 %v591_v23 }
  0x1a   :  { %539 = vmatprep.subr.bf16.mxu1 %v594_v26 }
  0x1b   :  { %518 = vmatpush3.bf16.msra.mxu0 %v593_v25 }
  0x1c   :  { %519 = vmatprep.subr.bf16.mxu0 %v596_v28 }
  0x1d   :  { %540 = vmatpush3.bf16.msra.mxu1 %v595_v27 }
  0x1e   :  { %541 = vmatprep.subr.bf16.mxu1 %v598_v30 }
  0x1f   :  { %520 = vmatpush3.bf16.msra.mxu0 %v597_v29 }
  0x20   :  { %554 = vmatprep.subr.bf16.mxu0 %v609_v35 }
  0x21   :  { %542 = vmatpush3.bf16.msra.mxu1 %v602_v34 }
  0x22   :  { %367 = vmatmul.mubr.bf16.vlgmr.msra.gmra.mrb[0].mxu0 %v463_v32 }
  0x23   :  { %555 = vmatpush3.bf16.msra.mxu0 %v605_v39  ;;  %562 = vmatprep.mubr.msk.bf16.mxu0 %vm610_vm0, %v609_v35 }
  0x24   :  { %407 = vmatmul.mubr.bf16.vlgmr.msra.gmra.mrb[0].mxu1 %v465_v37  ;;  %556 = vmatprep.subr.bf16.mxu0 %v609_v35 }
  0x27   :  { %557 = vmatpush3.bf16.msra.mxu0 %v606_v40 }
  0x28   :  { %558 = vmatprep.subr.bf16.mxu0 %v609_v35 }
  0x2b   :  { %559 = vmatpush3.bf16.msra.mxu0 %v607_v41 }
  0x2c   :  { %560 = vmatprep.subr.bf16.mxu0 %v609_v35 }
  0x2f   :  { %561 = vmatpush3.bf16.msra.mxu0 %v608_v42 }
  0x32   :  { %563 = vmatmul.mubr.msk.bf16.vlgmr.msra.gmra.mrb[4].mxu0 %vm330_vm1, %v601_v43 }
  0xf5   :  { %v521_v44 = vpop.f32.mrb[0].mxu0 }
  0xf6   :  { %v522_v46 = vpop.f32.mrb[1].mxu0 }
  0xf7   :  { %v523_v47 = vadd.f32 %v522_v46, %v521_v44  ;;  %v524_v48 = vpop.f32.mrb[2].mxu0  ;;  %v543_v49 = vpop.f32.mrb[0].mxu1 }
  0xf8   :  { %v525_v50 = vpop.f32.mrb[3].mxu0  ;;  %v544_v51 = vpop.f32.mrb[1].mxu1 }
  0xf9   :  { %v369_v52 = vadd.f32 %v523_v47, %v462_v45  ;;  %v545_v53 = vadd.f32 %v544_v51, %v543_v49  ;;  %v546_v54 = vpop.f32.mrb[2].mxu1 }
  0xfa   :  { %v547_v55 = vpop.f32.mrb[3].mxu1 }
  0xfb   :  { %v409_v56 = vadd.f32 %v545_v53, %v369_v52 }
 0x105   :  { %v448_v57 = vpop.f32.mrb[4].mxu0 }
 0x106   :  { %v449_v58 = vadd.f32 %v448_v57, %v409_v56  ;;  %v564_v59 = vpop.f32.mrb[5].mxu0 }
 0x107   :  { %v451_v60 = vpop.f32.mrb[6].mxu0 }
 0x108   :  { %v454_v61 = vmax.f32 %v449_v58, 0.0  ;;  %v565_v62 = vpop.f32.mrb[7].mxu0 }
 0x10a   :  { %v455_v63 = vpack.c.bf16 %v454_v61, %v454_v61 }
 0x10c   :  { %457 = vst.msk [vmem:[%s757_s3] sm:$0xf] %vm456_vm2, %v455_v63 }

// kernel: atari_pgn_forward.7
= control target key start
LH: loop header
LB: loop body
LE: loop exit
PB: predicated region body
PF: predicated region fallthrough
CT: control target
= control target key end

     0   :  { %v734_v1 = vmov 0   ;;  %vm140_vm0 = vcmask 523264   ;;  %v40_v50 = vlaneseq  ;;  %s921_s1 = inlined_call_operand.vmem [shape: bf16[64,512], index: 1, kind: input, shape index: {}]   ;;  %s922_s3 = inlined_call_operand.vmem [shape: bf16[512,128], index: 3, kind: input, shape index: {}]   ;;  %s923_s0 = inlined_call_operand.vmem [shape: bf16[8,64], index: 0, kind: input, shape index: {}]   ;;  %s924_s2 = inlined_call_operand.vmem [shape: f32[1,512], index: 2, kind: input, shape index: {}]   ;;  %s925_s4 = inlined_call_operand.vmem [shape: f32[1,128], index: 4, kind: input, shape index: {}]   ;;  %s926_s5 = inlined_call_operand.vmem [shape: f32[8,128], index: 5, kind: output, shape index: {}]  }
   0x1   :  { %v678_v0 = vld [vmem:[%s921_s1 + $0x4] ss:$16 sps:$4 sm:$0xff]   ;;  %176 = vmatprep.mubr.bf16.mxu0 %v734_v1  ;;  %217 = vmatprep.mubr.bf16.mxu1 %v734_v1  ;;  %v680_v2 = vld [vmem:[%s921_s1 + $0xc] ss:$16 sps:$4 sm:$0xff]   ;;  %v682_v3 = vld [vmem:[%s921_s1] ss:$16 sps:$4 sm:$0xff]  }
   0x2   :  { %144 = vmatprep.subr.bf16.mxu0 %v678_v0  ;;  %v683_v4 = vld [vmem:[%s921_s1 + $0x8] ss:$16 sps:$4 sm:$0xff]   ;;  %185 = vmatprep.subr.bf16.mxu1 %v680_v2  ;;  %v684_v5 = vld [vmem:[%s921_s1 + $0x24] ss:$16 sps:$4 sm:$0xff]   ;;  %v686_v6 = vld [vmem:[%s921_s1 + $0x2c] ss:$16 sps:$4 sm:$0xff]  }
   0x3   :  { %145 = vmatpush1.bf16.msra.mxu0 %v682_v3  ;;  %186 = vmatpush1.bf16.msra.mxu1 %v683_v4  ;;  %v688_v7 = vld [vmem:[%s921_s1 + $0x20] ss:$16 sps:$4 sm:$0xff]   ;;  %v689_v8 = vld [vmem:[%s921_s1 + $0x28] ss:$16 sps:$4 sm:$0xff]   ;;  %v690_v9 = vld [vmem:[%s921_s1 + $0x44] ss:$16 sps:$4 sm:$0xff]  }
   0x4   :  { %146 = vmatprep.subr.bf16.mxu0 %v684_v5  ;;  %187 = vmatprep.subr.bf16.mxu1 %v686_v6  ;;  %v692_v10 = vld [vmem:[%s921_s1 + $0x4c] ss:$16 sps:$4 sm:$0xff]   ;;  %v694_v11 = vld [vmem:[%s921_s1 + $0x40] ss:$16 sps:$4 sm:$0xff]   ;;  %v695_v12 = vld [vmem:[%s921_s1 + $0x48] ss:$16 sps:$4 sm:$0xff]  }
   0x5   :  { %v696_v13 = vld [vmem:[%s921_s1 + $0x64] ss:$16 sps:$4 sm:$0xff]   ;;  %v698_v14 = vld [vmem:[%s921_s1 + $0x6c] ss:$16 sps:$4 sm:$0xff]   ;;  %v700_v15 = vld [vmem:[%s921_s1 + $0x60] ss:$16 sps:$4 sm:$0xff]  }
   0x6   :  { %v701_v16 = vld [vmem:[%s921_s1 + $0x68] ss:$16 sps:$4 sm:$0xff]   ;;  %v702_v17 = vld [vmem:[%s922_s3 + $0x40] sm:$0xff]   ;;  %v710_v26 = vld [vmem:[%s922_s3 + $0x50] sm:$0xff]   ;;  %v41_v51 = vshrl.u32 %v40_v50, 7 }
   0x7   :  { %147 = vmatpush1.bf16.msra.mxu0 %v688_v7  ;;  %188 = vmatpush1.bf16.msra.mxu1 %v689_v8  ;;  %v703_v18 = vld [vmem:[%s922_s3 + $0xc0] sm:$0xff]   ;;  %v706_v22 = vld [vmem:[%s922_s3 + $0x48] sm:$0xff]   ;;  %v711_v27 = vld [vmem:[%s922_s3 + $0xd0] sm:$0xff]  }
   0x8   :  { %148 = vmatprep.subr.bf16.mxu0 %v690_v9  ;;  %189 = vmatprep.subr.bf16.mxu1 %v692_v10  ;;  %v21_v19 = vld [vmem:[%s923_s0] sm:$0xf]  ;;  %v707_v23 = vld [vmem:[%s922_s3 + $0xc8] sm:$0xff]   ;;  %v712_v28 = vld [vmem:[%s922_s3 + $0x10] sm:$0xff]   ;;  %v42_v52 = vsub.s32 0, %v41_v51  ;;  %v50_v53 = vsub.s32 2, %v41_v51 }
   0x9   :  { %v704_v20 = vld [vmem:[%s922_s3] sm:$0xff]   ;;  %v708_v24 = vld [vmem:[%s922_s3 + $0x8] sm:$0xff]   ;;  %v713_v29 = vld [vmem:[%s922_s3 + $0x90] sm:$0xff]   ;;  %v46_v55 = vsub.s32 1, %v41_v51  ;;  %v54_v56 = vsub.s32 3, %v41_v51 }
   0xa   :  { %v705_v21 = vld [vmem:[%s922_s3 + $0x80] sm:$0xff]   ;;  %v709_v25 = vld [vmem:[%s922_s3 + $0x88] sm:$0xff]   ;;  %v714_v30 = vld [vmem:[%s922_s3 + $0x58] sm:$0xff]  }
   0xb   :  { %149 = vmatpush1.bf16.msra.mxu0 %v694_v11  ;;  %190 = vmatpush1.bf16.msra.mxu1 %v695_v12  ;;  %v715_v31 = vld [vmem:[%s922_s3 + $0xd8] sm:$0xff]   ;;  %v718_v34 = vld [vmem:[%s922_s3 + $0x60] sm:$0xff]   ;;  %v722_v38 = vld [vmem:[%s922_s3 + $0x68] sm:$0xff]  }
   0xc   :  { %150 = vmatprep.subr.bf16.mxu0 %v696_v13  ;;  %191 = vmatprep.subr.bf16.mxu1 %v698_v14  ;;  %v716_v32 = vld [vmem:[%s922_s3 + $0x18] sm:$0xff]   ;;  %v719_v35 = vld [vmem:[%s922_s3 + $0xe0] sm:$0xff]   ;;  %v723_v39 = vld [vmem:[%s922_s3 + $0xe8] sm:$0xff]  }
   0xd   :  { %v717_v33 = vld [vmem:[%s922_s3 + $0x98] sm:$0xff]   ;;  %v720_v36 = vld [vmem:[%s922_s3 + $0x20] sm:$0xff]   ;;  %v724_v40 = vld [vmem:[%s922_s3 + $0x28] sm:$0xff]  }
   0xe   :  { %v721_v37 = vld [vmem:[%s922_s3 + $0xa0] sm:$0xff]   ;;  %v725_v41 = vld [vmem:[%s922_s3 + $0xa8] sm:$0xff]   ;;  %v726_v42 = vld [vmem:[%s922_s3 + $0x70] sm:$0xff]  }
   0xf   :  { %151 = vmatpush1.bf16.msra.mxu0 %v700_v15  ;;  %192 = vmatpush1.bf16.msra.mxu1 %v701_v16  ;;  %v727_v43 = vld [vmem:[%s922_s3 + $0xf0] sm:$0xff]   ;;  %v730_v46 = vld [vmem:[%s922_s3 + $0x78] sm:$0xff]   ;;  %v38_v54 = vld [vmem:[%s924_s2] sm:$0xf] }
  0x10   :  { %633 = vmatprep.subr.bf16.mxu0 %v702_v17  ;;  %655 = vmatprep.subr.bf16.mxu1 %v703_v18  ;;  %v728_v44 = vld [vmem:[%s922_s3 + $0x30] sm:$0xff]   ;;  %v731_v47 = vld [vmem:[%s922_s3 + $0xf8] sm:$0xff]   ;;  %v43_v57 = vrot.slane %v38_v54, %v42_v52  ;;  %v51_v58 = vrot.slane %v38_v54, %v50_v53  ;;  %v47_v59 = vrot.slane %v38_v54, %v46_v55 }
  0x11   :  { %v729_v45 = vld [vmem:[%s922_s3 + $0xb0] sm:$0xff]   ;;  %v732_v48 = vld [vmem:[%s922_s3 + $0x38] sm:$0xff]   ;;  %v55_v60 = vrot.slane %v38_v54, %v54_v56 }
  0x12   :  { %598 = vmatmul.mubr.msk.bf16.vlgmr.msra.gmra.mrb[0].mxu0 %vm140_vm0, %v21_v19  ;;  %599 = vmatmul.mubr.msk.bf16.vlgmr.msra.gmra.mrb[0].mxu1 %vm140_vm0, %v21_v19  ;;  %v733_v49 = vld [vmem:[%s922_s3 + $0xb8] sm:$0xff]   ;;  %v600_v19 = vld [vmem:[%s925_s4] ss:$0 sm:$0xff] }
  0x13   :  { %634 = vmatpush3.bf16.msra.mxu0 %v704_v20  ;;  %656 = vmatpush3.bf16.msra.mxu1 %v705_v21 }
  0x14   :  { %635 = vmatprep.subr.bf16.mxu0 %v706_v22  ;;  %657 = vmatprep.subr.bf16.mxu1 %v707_v23 }
  0x17   :  { %636 = vmatpush3.bf16.msra.mxu0 %v708_v24  ;;  %658 = vmatpush3.bf16.msra.mxu1 %v709_v25 }
  0x18   :  { %637 = vmatprep.subr.bf16.mxu0 %v710_v26  ;;  %659 = vmatprep.subr.bf16.mxu1 %v711_v27 }
  0x1b   :  { %638 = vmatpush3.bf16.msra.mxu0 %v712_v28  ;;  %660 = vmatpush3.bf16.msra.mxu1 %v713_v29 }
  0x1c   :  { %639 = vmatprep.subr.bf16.mxu0 %v714_v30  ;;  %661 = vmatprep.subr.bf16.mxu1 %v715_v31 }
  0x1f   :  { %640 = vmatpush3.bf16.msra.mxu0 %v716_v32  ;;  %662 = vmatpush3.bf16.msra.mxu1 %v717_v33 }
  0x20   :  { %641 = vmatprep.subr.bf16.mxu0 %v718_v34  ;;  %663 = vmatprep.subr.bf16.mxu1 %v719_v35 }
  0x23   :  { %642 = vmatpush3.bf16.msra.mxu0 %v720_v36  ;;  %664 = vmatpush3.bf16.msra.mxu1 %v721_v37 }
  0x24   :  { %643 = vmatprep.subr.bf16.mxu0 %v722_v38  ;;  %665 = vmatprep.subr.bf16.mxu1 %v723_v39 }
  0x27   :  { %644 = vmatpush3.bf16.msra.mxu0 %v724_v40  ;;  %666 = vmatpush3.bf16.msra.mxu1 %v725_v41 }
  0x28   :  { %645 = vmatprep.subr.bf16.mxu0 %v726_v42  ;;  %667 = vmatprep.subr.bf16.mxu1 %v727_v43 }
  0x2b   :  { %646 = vmatpush3.bf16.msra.mxu0 %v728_v44  ;;  %668 = vmatpush3.bf16.msra.mxu1 %v729_v45 }
  0x2c   :  { %647 = vmatprep.subr.bf16.mxu0 %v730_v46  ;;  %669 = vmatprep.subr.bf16.mxu1 %v731_v47 }
  0x2f   :  { %648 = vmatpush3.bf16.msra.mxu0 %v732_v48  ;;  %670 = vmatpush3.bf16.msra.mxu1 %v733_v49 }
  0xe5   :  { %v178_v61 = vpop.f32.mrb[0].mxu0  ;;  %v219_v62 = vpop.f32.mrb[0].mxu1 }
  0xe6   :  { %v179_v63 = vadd.f32 %v178_v61, %v43_v57  ;;  %v220_v0 = vadd.f32 %v219_v62, %v51_v58  ;;  %v180_v1 = vpop.f32.mrb[1].mxu0  ;;  %v221_v2 = vpop.f32.mrb[1].mxu1 }
  0xe7   :  { %v181_v3 = vadd.f32 %v180_v1, %v47_v59  ;;  %v222_v4 = vadd.f32 %v221_v2, %v55_v60  ;;  %v182_v5 = vpop.f32.mrb[2].mxu0  ;;  %v223_v6 = vpop.f32.mrb[2].mxu1 }
  0xe8   :  { %v226_v7 = vmax.f32 %v179_v63, 0.0  ;;  %v228_v8 = vmax.f32 %v220_v0, 0.0  ;;  %v183_v9 = vpop.f32.mrb[3].mxu0  ;;  %v224_v10 = vpop.f32.mrb[3].mxu1 }
  0xe9   :  { %v227_v11 = vmax.f32 %v181_v3, 0.0  ;;  %v229_v12 = vmax.f32 %v222_v4, 0.0 }
  0xea   :  { %v232_v13 = vpack.c.bf16 %v228_v8, %v228_v8  ;;  %v230_v16 = vpack.c.bf16 %v226_v7, %v226_v7 }
  0xeb   :  { %v231_v14 = vpack.c.bf16 %v227_v11, %v227_v11  ;;  %v233_v15 = vpack.c.bf16 %v229_v12, %v229_v12 }
  0xed   :  { %529 = vmatprep.mubr.bf16.mxu0 %v231_v14  ;;  %569 = vmatprep.mubr.bf16.mxu1 %v233_v15 }
  0xee   :  { %530 = vmatmul.mubr.bf16.vlgmr.msra.gmra.mrb[4].mxu0 %v230_v16  ;;  %570 = vmatmul.mubr.bf16.vlgmr.msra.gmra.mrb[4].mxu1 %v232_v13 }
 0x1c1   :  { %v649_v17 = vpop.f32.mrb[4].mxu0  ;;  %v671_v18 = vpop.f32.mrb[4].mxu1 }
 0x1c2   :  { %v650_v20 = vpop.f32.mrb[5].mxu0  ;;  %v672_v21 = vpop.f32.mrb[5].mxu1 }
 0x1c3   :  { %v651_v22 = vadd.f32 %v650_v20, %v649_v17  ;;  %v673_v23 = vadd.f32 %v672_v21, %v671_v18  ;;  %v652_v24 = vpop.f32.mrb[6].mxu0  ;;  %v674_v25 = vpop.f32.mrb[6].mxu1 }
 0x1c4   :  { %v653_v26 = vpop.f32.mrb[7].mxu0  ;;  %v675_v27 = vpop.f32.mrb[7].mxu1 }
 0x1c5   :  { %v532_v28 = vadd.f32 %v651_v22, %v600_v19 }
 0x1c7   :  { %v572_v29 = vadd.f32 %v673_v23, %v532_v28 }
 0x1c9   :  { %577 = vst [vmem:[%s926_s5] sm:$0xff] %v572_v29 }

</bundles_post_ra>
